<compile_context>
chip_gen: v5e
topology: v5e:2x2
jax: 0.10.0
libtpu: 0.0.40
codegen_flags: <defaults>
</compile_context>

<pallas_src>
import functools

import jax
import jax.numpy as jnp
from jax.experimental import pallas as pl
from jax.experimental.pallas import tpu as pltpu


def _conv_lane_packed_kernel(x_ref, w_ref, o_ref, *, cin, ksize, pad, hout):
    """Direct conv on a lane-packed layout, VPU only.

    x_ref: (Cin, Hp, L)     VMEM. L = N*Cout*Wg lanes; H zero-padded; the input is
                            replicated across the Cout lane groups.
    w_ref: (Cin*K*K, L)     VMEM. Per-tap weights broadcast across lanes, with the
                            W-boundary zero-pad masks already folded in.
    o_ref: (Hout, L)        VMEM. Lane-dense output slab.
    """
    lanes = x_ref.shape[-1]
    acc = jnp.zeros((hout, lanes), dtype=jnp.float32)

    # Fully unrolled: Cin*K*K = 36 taps for the 4-channel / 3x3 config.
    # (For scaled-up configs switch to lax.fori_loop(..., unroll=True).)
    for ci in range(cin):
        # One load + (no-op for f32) cast per channel plane, reused by all K*K taps.
        plane = x_ref[ci].astype(jnp.float32)                       # (Hp, L)
        for kw in range(ksize):
            dw = kw - pad
            # Lane shift for this kw, shared across all kh (XLU slot, ~free vs VALU).
            # Cross-group / zero-pad contamination is killed by the zeros folded
            # into the matching weight-table rows, so no mask is needed here.
            if dw == 0:
                shifted = plane
            else:
                shifted = pltpu.roll(plane, shift=(-dw) % lanes, axis=1)
            for kh in range(ksize):
                tap = (ci * ksize + kh) * ksize + kw
                patch = shifted[kh:kh + hout, :]                    # (Hout, L)
                acc = acc + w_ref[tap:tap + 1, :] * patch           # one vector FMA/tap

    o_ref[...] = acc.astype(o_ref.dtype)                            # single unmasked store


def auto_padding_conv2d(x_nchw, weight_oihw):
    """Forward of AutoPaddingConv2d: Conv2d(Cin, Cout, K, bias=False, padding=K-2).

    x_nchw:      (N, Cin, H, W)
    weight_oihw: (Cout, Cin, K, K)
    Returns the NCHW output identical to the PyTorch module.
    """
    n, cin, h, w_in = x_nchw.shape
    cout, cin_w, kh_, kw_ = weight_oihw.shape
    assert cin_w == cin and kh_ == kw_, "weight must be (Cout, Cin, K, K)"
    k = kh_
    # padding = K - 2 goes negative for K = 1.
    assert k >= 2, "AutoPaddingConv2d requires kernel_size >= 2 (padding = K - 2)"

    pad = k - 2
    hout = h + 2 * pad - k + 1
    wout = w_in + 2 * pad - k + 1
    hp = h + 2 * pad
    wg = max(w_in, wout)            # per-(n, co) lane-group width
    lanes = n * cout * wg           # = 2*4*16 = 128 exactly for this module's config

    # ---- Pack input: (N,Cin,H,W) -> (Cin, Hp, N*Cout*Wg).  H zero-padded, W padded
    # up to the group width, replicated across Cout.  pad/transpose/broadcast/reshape
    # fuse into one XLA producer -> no separate padded-copy HBM round trip.
    xp = jnp.pad(x_nchw, ((0, 0), (0, 0), (pad, pad), (0, wg - w_in)))
    xp = xp.transpose(1, 2, 0, 3)                                      # (Cin,Hp,N,Wg)
    xp = jnp.broadcast_to(xp[:, :, :, None, :], (cin, hp, n, cout, wg))
    x_packed = xp.reshape(cin, hp, lanes)

    # ---- Weight table: row t=(ci,kh,kw), lane l=(n,co,w) -> W[co,ci,kh,kw], already
    # multiplied by the W-boundary zero-pad mask for that kw (so the kernel does no
    # per-tap masking).
    w_pos = jnp.arange(wg)
    dw = jnp.arange(k) - pad                                           # shift per kw
    w_mask = ((w_pos[None, :] + dw[:, None] >= 0)
              & (w_pos[None, :] + dw[:, None] < w_in)).astype(jnp.float32)   # (K, Wg)
    wt = weight_oihw.transpose(1, 2, 3, 0).astype(jnp.float32)         # (Cin,K,K,Cout)
    wt = wt[:, :, :, None, :, None] * w_mask[None, None, :, None, None, :]
    w_tab = jnp.broadcast_to(wt, (cin, k, k, n, cout, wg)).reshape(cin * k * k, lanes)

    kernel = functools.partial(
        _conv_lane_packed_kernel, cin=cin, ksize=k, pad=pad, hout=hout)

    # Single invocation (grid=()): the whole batch lives in VMEM (~80 KB here).
    slab = pl.pallas_call(
        kernel,
        out_shape=jax.ShapeDtypeStruct((hout, lanes), x_nchw.dtype),
        in_specs=[
            pl.BlockSpec(memory_space=pltpu.MemorySpace.VMEM),
            pl.BlockSpec(memory_space=pltpu.MemorySpace.VMEM),
        ],
        out_specs=pl.BlockSpec(memory_space=pltpu.MemorySpace.VMEM),
    )(x_packed, w_tab)

    # ---- Unpack the lane-dense slab back to NCHW (cheap layout plumbing).
    out = slab.reshape(hout, n, cout, wg)[:, :, :, :wout]
    return out.transpose(1, 2, 0, 3)                                   # (N,Cout,Hout,Wout)


if __name__ == "__main__":
    # Module config: in_channels=4, kernel_size=3, is_extend=False
    #  -> out_channels=4, padding=1 ("same"-style conv).
    N, Cin, H, W = 2, 4, 16, 16
    K = 3
    Cout = Cin  # is_extend=False, out_channels=None

    key = jax.random.PRNGKey(0)
    kx, kw_key = jax.random.split(key)
    x = jax.random.normal(kx, (N, Cin, H, W), dtype=jnp.float32)
    # Deterministic weight init mimicking PyTorch's kaiming-uniform bound.
    fan_in = Cin * K * K
    bound = 1.0 / float(fan_in) ** 0.5
    weight = jax.random.uniform(
        kw_key, (Cout, Cin, K, K), dtype=jnp.float32, minval=-bound, maxval=bound)

    conv = jax.jit(auto_padding_conv2d)
    out = jax.block_until_ready(conv(x, weight))

    # Cross-check against XLA's conv (reference semantics of nn.Conv2d).
    ref = jax.lax.conv_general_dilated(
        x, weight, window_strides=(1, 1),
        padding=((K - 2, K - 2), (K - 2, K - 2)),
        dimension_numbers=("NCHW", "OIHW", "NCHW"))
    ref = jax.block_until_ready(ref)
    assert out.shape == ref.shape == (N, Cout, H, W)
    assert float(jnp.max(jnp.abs(out - ref))) < 1e-4

    print("KERNEL_OK")
</pallas_src>

<mosaic_0001>
module attributes {stable_mosaic.version = 11 : i64} {
  func.func @_conv_lane_packed_kernel(%arg0: memref<4x18x128xf32, #tpu.memory_space<vmem>>, %arg1: memref<36x128xf32, #tpu.memory_space<vmem>>, %arg2: memref<16x128xf32, #tpu.memory_space<vmem>>) attributes {dimension_semantics = [], scalar_prefetch = 0 : i64, scratch_operands = 0 : i64, tpu.core_type = #tpu.core_type<tc>} {
    %cst = arith.constant 0.000000e+00 : f32
    %0 = vector.broadcast %cst : f32 to vector<16x128xf32>
    %c0 = arith.constant 0 : index
    %c0_0 = arith.constant 0 : index
    %c0_1 = arith.constant 0 : index
    %1 = vector.load %arg0[%c0, %c0_0, %c0_1] : memref<4x18x128xf32, #tpu.memory_space<vmem>>, vector<1x18x128xf32>
    %2 = vector.shape_cast %1 : vector<1x18x128xf32> to vector<18x128xf32>
    %c1_i32 = arith.constant 1 : i32
    %3 = tpu.dynamic_rotate %2 by %c1_i32 dim 1 : vector<18x128xf32>, i32 -> vector<18x128xf32>
    %4 = vector.extract_strided_slice %3 {offsets = [0, 0], sizes = [16, 128], strides = [1, 1]} : vector<18x128xf32> to vector<16x128xf32>
    %c0_2 = arith.constant 0 : index
    %c0_3 = arith.constant 0 : index
    %5 = vector.load %arg1[%c0_2, %c0_3] : memref<36x128xf32, #tpu.memory_space<vmem>>, vector<1x128xf32>
    %6 = vector.broadcast %5 : vector<1x128xf32> to vector<16x128xf32>
    %7 = arith.mulf %6, %4 : vector<16x128xf32>
    %8 = arith.addf %0, %7 : vector<16x128xf32>
    %9 = vector.extract_strided_slice %3 {offsets = [1, 0], sizes = [16, 128], strides = [1, 1]} : vector<18x128xf32> to vector<16x128xf32>
    %c3 = arith.constant 3 : index
    %c0_4 = arith.constant 0 : index
    %10 = vector.load %arg1[%c3, %c0_4] : memref<36x128xf32, #tpu.memory_space<vmem>>, vector<1x128xf32>
    %11 = vector.broadcast %10 : vector<1x128xf32> to vector<16x128xf32>
    %12 = arith.mulf %11, %9 : vector<16x128xf32>
    %13 = arith.addf %8, %12 : vector<16x128xf32>
    %14 = vector.extract_strided_slice %3 {offsets = [2, 0], sizes = [16, 128], strides = [1, 1]} : vector<18x128xf32> to vector<16x128xf32>
    %c6 = arith.constant 6 : index
    %c0_5 = arith.constant 0 : index
    %15 = vector.load %arg1[%c6, %c0_5] : memref<36x128xf32, #tpu.memory_space<vmem>>, vector<1x128xf32>
    %16 = vector.broadcast %15 : vector<1x128xf32> to vector<16x128xf32>
    %17 = arith.mulf %16, %14 : vector<16x128xf32>
    %18 = arith.addf %13, %17 : vector<16x128xf32>
    %19 = vector.extract_strided_slice %2 {offsets = [0, 0], sizes = [16, 128], strides = [1, 1]} : vector<18x128xf32> to vector<16x128xf32>
    %c1 = arith.constant 1 : index
    %c0_6 = arith.constant 0 : index
    %20 = vector.load %arg1[%c1, %c0_6] : memref<36x128xf32, #tpu.memory_space<vmem>>, vector<1x128xf32>
    %21 = vector.broadcast %20 : vector<1x128xf32> to vector<16x128xf32>
    %22 = arith.mulf %21, %19 : vector<16x128xf32>
    %23 = arith.addf %18, %22 : vector<16x128xf32>
    %24 = vector.extract_strided_slice %2 {offsets = [1, 0], sizes = [16, 128], strides = [1, 1]} : vector<18x128xf32> to vector<16x128xf32>
    %c4 = arith.constant 4 : index
    %c0_7 = arith.constant 0 : index
    %25 = vector.load %arg1[%c4, %c0_7] : memref<36x128xf32, #tpu.memory_space<vmem>>, vector<1x128xf32>
    %26 = vector.broadcast %25 : vector<1x128xf32> to vector<16x128xf32>
    %27 = arith.mulf %26, %24 : vector<16x128xf32>
    %28 = arith.addf %23, %27 : vector<16x128xf32>
    %29 = vector.extract_strided_slice %2 {offsets = [2, 0], sizes = [16, 128], strides = [1, 1]} : vector<18x128xf32> to vector<16x128xf32>
    %c7 = arith.constant 7 : index
    %c0_8 = arith.constant 0 : index
    %30 = vector.load %arg1[%c7, %c0_8] : memref<36x128xf32, #tpu.memory_space<vmem>>, vector<1x128xf32>
    %31 = vector.broadcast %30 : vector<1x128xf32> to vector<16x128xf32>
    %32 = arith.mulf %31, %29 : vector<16x128xf32>
    %33 = arith.addf %28, %32 : vector<16x128xf32>
    %c127_i32 = arith.constant 127 : i32
    %34 = tpu.dynamic_rotate %2 by %c127_i32 dim 1 : vector<18x128xf32>, i32 -> vector<18x128xf32>
    %35 = vector.extract_strided_slice %34 {offsets = [0, 0], sizes = [16, 128], strides = [1, 1]} : vector<18x128xf32> to vector<16x128xf32>
    %c2 = arith.constant 2 : index
    %c0_9 = arith.constant 0 : index
    %36 = vector.load %arg1[%c2, %c0_9] : memref<36x128xf32, #tpu.memory_space<vmem>>, vector<1x128xf32>
    %37 = vector.broadcast %36 : vector<1x128xf32> to vector<16x128xf32>
    %38 = arith.mulf %37, %35 : vector<16x128xf32>
    %39 = arith.addf %33, %38 : vector<16x128xf32>
    %40 = vector.extract_strided_slice %34 {offsets = [1, 0], sizes = [16, 128], strides = [1, 1]} : vector<18x128xf32> to vector<16x128xf32>
    %c5 = arith.constant 5 : index
    %c0_10 = arith.constant 0 : index
    %41 = vector.load %arg1[%c5, %c0_10] : memref<36x128xf32, #tpu.memory_space<vmem>>, vector<1x128xf32>
    %42 = vector.broadcast %41 : vector<1x128xf32> to vector<16x128xf32>
    %43 = arith.mulf %42, %40 : vector<16x128xf32>
    %44 = arith.addf %39, %43 : vector<16x128xf32>
    %45 = vector.extract_strided_slice %34 {offsets = [2, 0], sizes = [16, 128], strides = [1, 1]} : vector<18x128xf32> to vector<16x128xf32>
    %c8 = arith.constant 8 : index
    %c0_11 = arith.constant 0 : index
    %46 = vector.load %arg1[%c8, %c0_11] : memref<36x128xf32, #tpu.memory_space<vmem>>, vector<1x128xf32>
    %47 = vector.broadcast %46 : vector<1x128xf32> to vector<16x128xf32>
    %48 = arith.mulf %47, %45 : vector<16x128xf32>
    %49 = arith.addf %44, %48 : vector<16x128xf32>
    %c1_12 = arith.constant 1 : index
    %c0_13 = arith.constant 0 : index
    %c0_14 = arith.constant 0 : index
    %50 = vector.load %arg0[%c1_12, %c0_13, %c0_14] : memref<4x18x128xf32, #tpu.memory_space<vmem>>, vector<1x18x128xf32>
    %51 = vector.shape_cast %50 : vector<1x18x128xf32> to vector<18x128xf32>
    %c1_i32_15 = arith.constant 1 : i32
    %52 = tpu.dynamic_rotate %51 by %c1_i32_15 dim 1 : vector<18x128xf32>, i32 -> vector<18x128xf32>
    %53 = vector.extract_strided_slice %52 {offsets = [0, 0], sizes = [16, 128], strides = [1, 1]} : vector<18x128xf32> to vector<16x128xf32>
    %c9 = arith.constant 9 : index
    %c0_16 = arith.constant 0 : index
    %54 = vector.load %arg1[%c9, %c0_16] : memref<36x128xf32, #tpu.memory_space<vmem>>, vector<1x128xf32>
    %55 = vector.broadcast %54 : vector<1x128xf32> to vector<16x128xf32>
    %56 = arith.mulf %55, %53 : vector<16x128xf32>
    %57 = arith.addf %49, %56 : vector<16x128xf32>
    %58 = vector.extract_strided_slice %52 {offsets = [1, 0], sizes = [16, 128], strides = [1, 1]} : vector<18x128xf32> to vector<16x128xf32>
    %c12 = arith.constant 12 : index
    %c0_17 = arith.constant 0 : index
    %59 = vector.load %arg1[%c12, %c0_17] : memref<36x128xf32, #tpu.memory_space<vmem>>, vector<1x128xf32>
    %60 = vector.broadcast %59 : vector<1x128xf32> to vector<16x128xf32>
    %61 = arith.mulf %60, %58 : vector<16x128xf32>
    %62 = arith.addf %57, %61 : vector<16x128xf32>
    %63 = vector.extract_strided_slice %52 {offsets = [2, 0], sizes = [16, 128], strides = [1, 1]} : vector<18x128xf32> to vector<16x128xf32>
    %c15 = arith.constant 15 : index
    %c0_18 = arith.constant 0 : index
    %64 = vector.load %arg1[%c15, %c0_18] : memref<36x128xf32, #tpu.memory_space<vmem>>, vector<1x128xf32>
    %65 = vector.broadcast %64 : vector<1x128xf32> to vector<16x128xf32>
    %66 = arith.mulf %65, %63 : vector<16x128xf32>
    %67 = arith.addf %62, %66 : vector<16x128xf32>
    %68 = vector.extract_strided_slice %51 {offsets = [0, 0], sizes = [16, 128], strides = [1, 1]} : vector<18x128xf32> to vector<16x128xf32>
    %c10 = arith.constant 10 : index
    %c0_19 = arith.constant 0 : index
    %69 = vector.load %arg1[%c10, %c0_19] : memref<36x128xf32, #tpu.memory_space<vmem>>, vector<1x128xf32>
    %70 = vector.broadcast %69 : vector<1x128xf32> to vector<16x128xf32>
    %71 = arith.mulf %70, %68 : vector<16x128xf32>
    %72 = arith.addf %67, %71 : vector<16x128xf32>
    %73 = vector.extract_strided_slice %51 {offsets = [1, 0], sizes = [16, 128], strides = [1, 1]} : vector<18x128xf32> to vector<16x128xf32>
    %c13 = arith.constant 13 : index
    %c0_20 = arith.constant 0 : index
    %74 = vector.load %arg1[%c13, %c0_20] : memref<36x128xf32, #tpu.memory_space<vmem>>, vector<1x128xf32>
    %75 = vector.broadcast %74 : vector<1x128xf32> to vector<16x128xf32>
    %76 = arith.mulf %75, %73 : vector<16x128xf32>
    %77 = arith.addf %72, %76 : vector<16x128xf32>
    %78 = vector.extract_strided_slice %51 {offsets = [2, 0], sizes = [16, 128], strides = [1, 1]} : vector<18x128xf32> to vector<16x128xf32>
    %c16 = arith.constant 16 : index
    %c0_21 = arith.constant 0 : index
    %79 = vector.load %arg1[%c16, %c0_21] : memref<36x128xf32, #tpu.memory_space<vmem>>, vector<1x128xf32>
    %80 = vector.broadcast %79 : vector<1x128xf32> to vector<16x128xf32>
    %81 = arith.mulf %80, %78 : vector<16x128xf32>
    %82 = arith.addf %77, %81 : vector<16x128xf32>
    %c127_i32_22 = arith.constant 127 : i32
    %83 = tpu.dynamic_rotate %51 by %c127_i32_22 dim 1 : vector<18x128xf32>, i32 -> vector<18x128xf32>
    %84 = vector.extract_strided_slice %83 {offsets = [0, 0], sizes = [16, 128], strides = [1, 1]} : vector<18x128xf32> to vector<16x128xf32>
    %c11 = arith.constant 11 : index
    %c0_23 = arith.constant 0 : index
    %85 = vector.load %arg1[%c11, %c0_23] : memref<36x128xf32, #tpu.memory_space<vmem>>, vector<1x128xf32>
    %86 = vector.broadcast %85 : vector<1x128xf32> to vector<16x128xf32>
    %87 = arith.mulf %86, %84 : vector<16x128xf32>
    %88 = arith.addf %82, %87 : vector<16x128xf32>
    %89 = vector.extract_strided_slice %83 {offsets = [1, 0], sizes = [16, 128], strides = [1, 1]} : vector<18x128xf32> to vector<16x128xf32>
    %c14 = arith.constant 14 : index
    %c0_24 = arith.constant 0 : index
    %90 = vector.load %arg1[%c14, %c0_24] : memref<36x128xf32, #tpu.memory_space<vmem>>, vector<1x128xf32>
    %91 = vector.broadcast %90 : vector<1x128xf32> to vector<16x128xf32>
    %92 = arith.mulf %91, %89 : vector<16x128xf32>
    %93 = arith.addf %88, %92 : vector<16x128xf32>
    %94 = vector.extract_strided_slice %83 {offsets = [2, 0], sizes = [16, 128], strides = [1, 1]} : vector<18x128xf32> to vector<16x128xf32>
    %c17 = arith.constant 17 : index
    %c0_25 = arith.constant 0 : index
    %95 = vector.load %arg1[%c17, %c0_25] : memref<36x128xf32, #tpu.memory_space<vmem>>, vector<1x128xf32>
    %96 = vector.broadcast %95 : vector<1x128xf32> to vector<16x128xf32>
    %97 = arith.mulf %96, %94 : vector<16x128xf32>
    %98 = arith.addf %93, %97 : vector<16x128xf32>
    %c2_26 = arith.constant 2 : index
    %c0_27 = arith.constant 0 : index
    %c0_28 = arith.constant 0 : index
    %99 = vector.load %arg0[%c2_26, %c0_27, %c0_28] : memref<4x18x128xf32, #tpu.memory_space<vmem>>, vector<1x18x128xf32>
    %100 = vector.shape_cast %99 : vector<1x18x128xf32> to vector<18x128xf32>
    %c1_i32_29 = arith.constant 1 : i32
    %101 = tpu.dynamic_rotate %100 by %c1_i32_29 dim 1 : vector<18x128xf32>, i32 -> vector<18x128xf32>
    %102 = vector.extract_strided_slice %101 {offsets = [0, 0], sizes = [16, 128], strides = [1, 1]} : vector<18x128xf32> to vector<16x128xf32>
    %c18 = arith.constant 18 : index
    %c0_30 = arith.constant 0 : index
    %103 = vector.load %arg1[%c18, %c0_30] : memref<36x128xf32, #tpu.memory_space<vmem>>, vector<1x128xf32>
    %104 = vector.broadcast %103 : vector<1x128xf32> to vector<16x128xf32>
    %105 = arith.mulf %104, %102 : vector<16x128xf32>
    %106 = arith.addf %98, %105 : vector<16x128xf32>
    %107 = vector.extract_strided_slice %101 {offsets = [1, 0], sizes = [16, 128], strides = [1, 1]} : vector<18x128xf32> to vector<16x128xf32>
    %c21 = arith.constant 21 : index
    %c0_31 = arith.constant 0 : index
    %108 = vector.load %arg1[%c21, %c0_31] : memref<36x128xf32, #tpu.memory_space<vmem>>, vector<1x128xf32>
    %109 = vector.broadcast %108 : vector<1x128xf32> to vector<16x128xf32>
    %110 = arith.mulf %109, %107 : vector<16x128xf32>
    %111 = arith.addf %106, %110 : vector<16x128xf32>
    %112 = vector.extract_strided_slice %101 {offsets = [2, 0], sizes = [16, 128], strides = [1, 1]} : vector<18x128xf32> to vector<16x128xf32>
    %c24 = arith.constant 24 : index
    %c0_32 = arith.constant 0 : index
    %113 = vector.load %arg1[%c24, %c0_32] : memref<36x128xf32, #tpu.memory_space<vmem>>, vector<1x128xf32>
    %114 = vector.broadcast %113 : vector<1x128xf32> to vector<16x128xf32>
    %115 = arith.mulf %114, %112 : vector<16x128xf32>
    %116 = arith.addf %111, %115 : vector<16x128xf32>
    %117 = vector.extract_strided_slice %100 {offsets = [0, 0], sizes = [16, 128], strides = [1, 1]} : vector<18x128xf32> to vector<16x128xf32>
    %c19 = arith.constant 19 : index
    %c0_33 = arith.constant 0 : index
    %118 = vector.load %arg1[%c19, %c0_33] : memref<36x128xf32, #tpu.memory_space<vmem>>, vector<1x128xf32>
    %119 = vector.broadcast %118 : vector<1x128xf32> to vector<16x128xf32>
    %120 = arith.mulf %119, %117 : vector<16x128xf32>
    %121 = arith.addf %116, %120 : vector<16x128xf32>
    %122 = vector.extract_strided_slice %100 {offsets = [1, 0], sizes = [16, 128], strides = [1, 1]} : vector<18x128xf32> to vector<16x128xf32>
    %c22 = arith.constant 22 : index
    %c0_34 = arith.constant 0 : index
    %123 = vector.load %arg1[%c22, %c0_34] : memref<36x128xf32, #tpu.memory_space<vmem>>, vector<1x128xf32>
    %124 = vector.broadcast %123 : vector<1x128xf32> to vector<16x128xf32>
    %125 = arith.mulf %124, %122 : vector<16x128xf32>
    %126 = arith.addf %121, %125 : vector<16x128xf32>
    %127 = vector.extract_strided_slice %100 {offsets = [2, 0], sizes = [16, 128], strides = [1, 1]} : vector<18x128xf32> to vector<16x128xf32>
    %c25 = arith.constant 25 : index
    %c0_35 = arith.constant 0 : index
    %128 = vector.load %arg1[%c25, %c0_35] : memref<36x128xf32, #tpu.memory_space<vmem>>, vector<1x128xf32>
    %129 = vector.broadcast %128 : vector<1x128xf32> to vector<16x128xf32>
    %130 = arith.mulf %129, %127 : vector<16x128xf32>
    %131 = arith.addf %126, %130 : vector<16x128xf32>
    %c127_i32_36 = arith.constant 127 : i32
    %132 = tpu.dynamic_rotate %100 by %c127_i32_36 dim 1 : vector<18x128xf32>, i32 -> vector<18x128xf32>
    %133 = vector.extract_strided_slice %132 {offsets = [0, 0], sizes = [16, 128], strides = [1, 1]} : vector<18x128xf32> to vector<16x128xf32>
    %c20 = arith.constant 20 : index
    %c0_37 = arith.constant 0 : index
    %134 = vector.load %arg1[%c20, %c0_37] : memref<36x128xf32, #tpu.memory_space<vmem>>, vector<1x128xf32>
    %135 = vector.broadcast %134 : vector<1x128xf32> to vector<16x128xf32>
    %136 = arith.mulf %135, %133 : vector<16x128xf32>
    %137 = arith.addf %131, %136 : vector<16x128xf32>
    %138 = vector.extract_strided_slice %132 {offsets = [1, 0], sizes = [16, 128], strides = [1, 1]} : vector<18x128xf32> to vector<16x128xf32>
    %c23 = arith.constant 23 : index
    %c0_38 = arith.constant 0 : index
    %139 = vector.load %arg1[%c23, %c0_38] : memref<36x128xf32, #tpu.memory_space<vmem>>, vector<1x128xf32>
    %140 = vector.broadcast %139 : vector<1x128xf32> to vector<16x128xf32>
    %141 = arith.mulf %140, %138 : vector<16x128xf32>
    %142 = arith.addf %137, %141 : vector<16x128xf32>
    %143 = vector.extract_strided_slice %132 {offsets = [2, 0], sizes = [16, 128], strides = [1, 1]} : vector<18x128xf32> to vector<16x128xf32>
    %c26 = arith.constant 26 : index
    %c0_39 = arith.constant 0 : index
    %144 = vector.load %arg1[%c26, %c0_39] : memref<36x128xf32, #tpu.memory_space<vmem>>, vector<1x128xf32>
    %145 = vector.broadcast %144 : vector<1x128xf32> to vector<16x128xf32>
    %146 = arith.mulf %145, %143 : vector<16x128xf32>
    %147 = arith.addf %142, %146 : vector<16x128xf32>
    %c3_40 = arith.constant 3 : index
    %c0_41 = arith.constant 0 : index
    %c0_42 = arith.constant 0 : index
    %148 = vector.load %arg0[%c3_40, %c0_41, %c0_42] : memref<4x18x128xf32, #tpu.memory_space<vmem>>, vector<1x18x128xf32>
    %149 = vector.shape_cast %148 : vector<1x18x128xf32> to vector<18x128xf32>
    %c1_i32_43 = arith.constant 1 : i32
    %150 = tpu.dynamic_rotate %149 by %c1_i32_43 dim 1 : vector<18x128xf32>, i32 -> vector<18x128xf32>
    %151 = vector.extract_strided_slice %150 {offsets = [0, 0], sizes = [16, 128], strides = [1, 1]} : vector<18x128xf32> to vector<16x128xf32>
    %c27 = arith.constant 27 : index
    %c0_44 = arith.constant 0 : index
    %152 = vector.load %arg1[%c27, %c0_44] : memref<36x128xf32, #tpu.memory_space<vmem>>, vector<1x128xf32>
    %153 = vector.broadcast %152 : vector<1x128xf32> to vector<16x128xf32>
    %154 = arith.mulf %153, %151 : vector<16x128xf32>
    %155 = arith.addf %147, %154 : vector<16x128xf32>
    %156 = vector.extract_strided_slice %150 {offsets = [1, 0], sizes = [16, 128], strides = [1, 1]} : vector<18x128xf32> to vector<16x128xf32>
    %c30 = arith.constant 30 : index
    %c0_45 = arith.constant 0 : index
    %157 = vector.load %arg1[%c30, %c0_45] : memref<36x128xf32, #tpu.memory_space<vmem>>, vector<1x128xf32>
    %158 = vector.broadcast %157 : vector<1x128xf32> to vector<16x128xf32>
    %159 = arith.mulf %158, %156 : vector<16x128xf32>
    %160 = arith.addf %155, %159 : vector<16x128xf32>
    %161 = vector.extract_strided_slice %150 {offsets = [2, 0], sizes = [16, 128], strides = [1, 1]} : vector<18x128xf32> to vector<16x128xf32>
    %c33 = arith.constant 33 : index
    %c0_46 = arith.constant 0 : index
    %162 = vector.load %arg1[%c33, %c0_46] : memref<36x128xf32, #tpu.memory_space<vmem>>, vector<1x128xf32>
    %163 = vector.broadcast %162 : vector<1x128xf32> to vector<16x128xf32>
    %164 = arith.mulf %163, %161 : vector<16x128xf32>
    %165 = arith.addf %160, %164 : vector<16x128xf32>
    %166 = vector.extract_strided_slice %149 {offsets = [0, 0], sizes = [16, 128], strides = [1, 1]} : vector<18x128xf32> to vector<16x128xf32>
    %c28 = arith.constant 28 : index
    %c0_47 = arith.constant 0 : index
    %167 = vector.load %arg1[%c28, %c0_47] : memref<36x128xf32, #tpu.memory_space<vmem>>, vector<1x128xf32>
    %168 = vector.broadcast %167 : vector<1x128xf32> to vector<16x128xf32>
    %169 = arith.mulf %168, %166 : vector<16x128xf32>
    %170 = arith.addf %165, %169 : vector<16x128xf32>
    %171 = vector.extract_strided_slice %149 {offsets = [1, 0], sizes = [16, 128], strides = [1, 1]} : vector<18x128xf32> to vector<16x128xf32>
    %c31 = arith.constant 31 : index
    %c0_48 = arith.constant 0 : index
    %172 = vector.load %arg1[%c31, %c0_48] : memref<36x128xf32, #tpu.memory_space<vmem>>, vector<1x128xf32>
    %173 = vector.broadcast %172 : vector<1x128xf32> to vector<16x128xf32>
    %174 = arith.mulf %173, %171 : vector<16x128xf32>
    %175 = arith.addf %170, %174 : vector<16x128xf32>
    %176 = vector.extract_strided_slice %149 {offsets = [2, 0], sizes = [16, 128], strides = [1, 1]} : vector<18x128xf32> to vector<16x128xf32>
    %c34 = arith.constant 34 : index
    %c0_49 = arith.constant 0 : index
    %177 = vector.load %arg1[%c34, %c0_49] : memref<36x128xf32, #tpu.memory_space<vmem>>, vector<1x128xf32>
    %178 = vector.broadcast %177 : vector<1x128xf32> to vector<16x128xf32>
    %179 = arith.mulf %178, %176 : vector<16x128xf32>
    %180 = arith.addf %175, %179 : vector<16x128xf32>
    %c127_i32_50 = arith.constant 127 : i32
    %181 = tpu.dynamic_rotate %149 by %c127_i32_50 dim 1 : vector<18x128xf32>, i32 -> vector<18x128xf32>
    %182 = vector.extract_strided_slice %181 {offsets = [0, 0], sizes = [16, 128], strides = [1, 1]} : vector<18x128xf32> to vector<16x128xf32>
    %c29 = arith.constant 29 : index
    %c0_51 = arith.constant 0 : index
    %183 = vector.load %arg1[%c29, %c0_51] : memref<36x128xf32, #tpu.memory_space<vmem>>, vector<1x128xf32>
    %184 = vector.broadcast %183 : vector<1x128xf32> to vector<16x128xf32>
    %185 = arith.mulf %184, %182 : vector<16x128xf32>
    %186 = arith.addf %180, %185 : vector<16x128xf32>
    %187 = vector.extract_strided_slice %181 {offsets = [1, 0], sizes = [16, 128], strides = [1, 1]} : vector<18x128xf32> to vector<16x128xf32>
    %c32 = arith.constant 32 : index
    %c0_52 = arith.constant 0 : index
    %188 = vector.load %arg1[%c32, %c0_52] : memref<36x128xf32, #tpu.memory_space<vmem>>, vector<1x128xf32>
    %189 = vector.broadcast %188 : vector<1x128xf32> to vector<16x128xf32>
    %190 = arith.mulf %189, %187 : vector<16x128xf32>
    %191 = arith.addf %186, %190 : vector<16x128xf32>
    %192 = vector.extract_strided_slice %181 {offsets = [2, 0], sizes = [16, 128], strides = [1, 1]} : vector<18x128xf32> to vector<16x128xf32>
    %c35 = arith.constant 35 : index
    %c0_53 = arith.constant 0 : index
    %193 = vector.load %arg1[%c35, %c0_53] : memref<36x128xf32, #tpu.memory_space<vmem>>, vector<1x128xf32>
    %194 = vector.broadcast %193 : vector<1x128xf32> to vector<16x128xf32>
    %195 = arith.mulf %194, %192 : vector<16x128xf32>
    %196 = arith.addf %191, %195 : vector<16x128xf32>
    %c0_54 = arith.constant 0 : index
    %c0_55 = arith.constant 0 : index
    %197 = vector.load %arg2[%c0_54, %c0_55] : memref<16x128xf32, #tpu.memory_space<vmem>>, vector<16x128xf32>
    tpu.vector_store %arg2[%c0_54, %c0_55], %196 {strides = array<i32>} : memref<16x128xf32, #tpu.memory_space<vmem>>, vector<16x128xf32>,
    return
  }
}

</mosaic_0001>

<bundles_post_ra>
// kernel: auto_padding_conv2d.1
= control target key start
LH: loop header
LB: loop body
LE: loop exit
PB: predicated region body
PF: predicated region fallthrough
CT: control target
= control target key end

     0   :  { %s609_s11 = smov 1   ;;  %s610_s16 = smov 127   ;;  %vm34_vm0 = vcmask 1046528   ;;  %vm52_vm1 = vcmask 1045504   ;;  %s1016_s0 = inlined_call_operand.vmem [shape: f32[4,18,128], index: 0, kind: input, shape index: {}]   ;;  %s1017_s1 = inlined_call_operand.vmem [shape: f32[36,128], index: 1, kind: input, shape index: {}]   ;;  %s1018_s2 = inlined_call_operand.vmem [shape: f32[16,128], index: 2, kind: output, shape index: {}]  }
   0x1   :  { %v629_v0 = vld [vmem:[%s1016_s0] sm:$0xff]  ;;  %v636_v1 = vld [vmem:[%s1016_s0 + $0x10] sm:$0x3]  ;;  %v641_v2 = vld [vmem:[%s1016_s0 + $0x8] sm:$0xff] }
   0x2   :  { %14 = vrot.lane.b32.xlu0 %v629_v0, %s609_s11  ;;  %18 = vrot.lane.b32.xlu1 %v636_v1, %s609_s11  ;;  %v656_v3 = vld [vmem:[%s1016_s0 + $0x20] sm:$0xff]  ;;  %v661_v4 = vld [vmem:[%s1016_s0 + $0x18] sm:$0xff] }
   0x3   :  { %104 = vrot.lane.b32.xlu2 %v641_v2, %s610_s16  ;;  %v564_v5 = vld [vmem:[%s1016_s0 + $0x28] sm:$0x3]  ;;  %v679_v6 = vld [vmem:[%s1016_s0 + $0x30] sm:$0xff]  ;;  %v684_v7 = vld [vmem:[%s1016_s0 + $0x38] sm:$0xff] }
   0x4   :  { %v689_v8 = vld [vmem:[%s1016_s0 + $0x40] sm:$0x3]  ;;  %v706_v9 = vld [vmem:[%s1016_s0 + $0x48] sm:$0xff]  ;;  %v711_v10 = vld [vmem:[%s1016_s0 + $0x50] sm:$0xff] }
   0x5   :  { %v716_v11 = vld [vmem:[%s1016_s0 + $0x58] sm:$0x3]  ;;  %v577_v12 = vld [vmem:[%s1017_s1 + $0xd] ss:$0 sm:$0xff]  ;;  %v578_v13 = vld [vmem:[%s1017_s1 + $0x10] ss:$0 sm:$0xff] }
   0x6   :  { %v207_v14 = vmul.f32 %v577_v12, %v656_v3  ;;  %v224_v15 = vmul.f32 %v578_v13, %v656_v3  ;;  %v208_v16 = vmul.f32 %v577_v12, %v564_v5  ;;  %v225_v17 = vmul.f32 %v578_v13, %v564_v5  ;;  %v574_v18 = vld [vmem:[%s1017_s1 + $0x4] ss:$0 sm:$0xff]  ;;  %v575_v25 = vld [vmem:[%s1017_s1 + $0x7] ss:$0 sm:$0xff]  ;;  %v750_v26 = vld [vmem:[%s1017_s1 + $0x1] ss:$0 sm:$0xff] }
   0x7   :  { %v206_v19 = vmul.f32 %v577_v12, %v661_v4  ;;  %v753_v27 = vmul.f32 %v574_v18, %v629_v0  ;;  %v223_v28 = vmul.f32 %v578_v13, %v661_v4  ;;  %v757_v30 = vmul.f32 %v574_v18, %v636_v1  ;;  %v580_v33 = vld [vmem:[%s1017_s1 + $0x16] ss:$0 sm:$0xff]  ;;  %v581_v34 = vld [vmem:[%s1017_s1 + $0x19] ss:$0 sm:$0xff]  ;;  %v585_v40 = vld [vmem:[%s1017_s1 + $0x3] ss:$0 sm:$0xff] }
   0x8   :  { %v213_v20 = vrot.slane %v207_v14, 1  ;;  %v230_v21 = vrot.slane %v224_v15, 2  ;;  %v215_v22 = vrot.slane %v208_v16, 1  ;;  %v232_v23 = vrot.slane %v225_v17, 2  ;;  %v586_v47 = vld [vmem:[%s1017_s1 + $0x6] ss:$0 sm:$0xff] }
   0x9   :  { %v760_v31 = vmul.f32 %v574_v18, %v641_v2  ;;  %v212_v32 = vrot.slane %v206_v19, 1  ;;  %v775_v38 = vmul.f32 %v575_v25, %v629_v0  ;;  %v778_v39 = vmul.f32 %v575_v25, %v636_v1  ;;  %v584_v60 = vld [vmem:[%s1017_s1] ss:$0 sm:$0xff] }
   0xa   :  { %16 = vrot.lane.b32.xlu0 %v641_v2, %s609_s11  ;;  %102 = vrot.lane.b32.xlu1 %v629_v0, %s610_s16  ;;  %v769_v36 = vsel %vm34_vm0, %v213_v20, %v215_v22  ;;  %v772_v37 = vsel %vm52_vm1, %v230_v21, %v232_v23  ;;  %v785_v41 = vmul.f32 %v750_v26, %v629_v0  ;;  %v229_v43 = vrot.slane %v223_v28, 2  ;;  %v589_v28 = vld [vmem:[%s1017_s1 + $0x8] ss:$0 sm:$0xff] }
   0xb   :  { %106 = vrot.lane.b32.xlu2 %v636_v1, %s610_s16  ;;  %v788_v42 = vmul.f32 %v575_v25, %v641_v2  ;;  %v76_v44 = vrot.slane %v753_v27, 1  ;;  %v79_v45 = vrot.slane %v757_v30, 1  ;;  %v77_v46 = vrot.slane %v760_v31, 1 }
   0xc   :  { %v797_v49 = vmul.f32 %v580_v33, %v684_v7  ;;  %v800_v50 = vmul.f32 %v581_v34, %v684_v7  ;;  %v803_v51 = vmul.f32 %v580_v33, %v679_v6  ;;  %v806_v52 = vsel %vm34_vm0, %v212_v32, %v213_v20 }
   0xd   :  { %v93_v53 = vrot.slane %v775_v38, 2  ;;  %v96_v54 = vrot.slane %v778_v39, 2  ;;  %v94_v57 = vrot.slane %v788_v42, 2  ;;  %v812_v58 = vmul.f32 %v581_v34, %v679_v6 }
   0xe   :  { %v815_v59 = vmul.f32 %v580_v33, %v689_v8  ;;  %v821_v63 = vsel %vm52_vm1, %v229_v43, %v230_v21  ;;  %v349_v14 = vrot.slane %v797_v49, 1  ;;  %v366_v15 = vrot.slane %v800_v50, 2 }
   0xf   :  { %v348_v16 = vrot.slane %v803_v51, 1  ;;  %v361_v17 = vmul.f32 %v581_v34, %v689_v8  ;;  %v365_v23 = vrot.slane %v812_v58, 2  ;;  %v576_v51 = vld [vmem:[%s1017_s1 + $0xa] ss:$0 sm:$0xff] }
  0x10   :  { %v351_v25 = vrot.slane %v815_v59, 1 }
  0x12   :  { %152 = vrot.lane.b32.xlu0 %v661_v4, %s609_s11  ;;  %154 = vrot.lane.b32.xlu1 %v656_v3, %s609_s11 }
  0x13   :  { %156 = vrot.lane.b32.xlu2 %v564_v5, %s609_s11 }
  0x1a   :  { %238 = vrot.lane.b32.xlu0 %v661_v4, %s610_s16  ;;  %240 = vrot.lane.b32.xlu1 %v656_v3, %s610_s16 }
  0x1b   :  { %242 = vrot.lane.b32.xlu2 %v564_v5, %s610_s16  ;;  %v588_v5 = vld [vmem:[%s1017_s1 + $0x5] ss:$0 sm:$0xff] }
  0x22   :  { %288 = vrot.lane.b32.xlu0 %v679_v6, %s609_s11  ;;  %290 = vrot.lane.b32.xlu1 %v684_v7, %s609_s11 }
  0x23   :  { %292 = vrot.lane.b32.xlu2 %v689_v8, %s609_s11 }
  0x2a   :  { %374 = vrot.lane.b32.xlu0 %v679_v6, %s610_s16  ;;  %376 = vrot.lane.b32.xlu1 %v684_v7, %s610_s16 }
  0x2b   :  { %378 = vrot.lane.b32.xlu2 %v689_v8, %s610_s16  ;;  %v587_v8 = vld [vmem:[%s1017_s1 + $0x2] ss:$0 sm:$0xff] }
  0x32   :  { %424 = vrot.lane.b32.xlu0 %v706_v9, %s609_s11  ;;  %426 = vrot.lane.b32.xlu1 %v711_v10, %s609_s11 }
  0x33   :  { %428 = vrot.lane.b32.xlu2 %v716_v11, %s609_s11 }
  0x3a   :  { %510 = vrot.lane.b32.xlu0 %v706_v9, %s610_s16  ;;  %512 = vrot.lane.b32.xlu1 %v711_v10, %s610_s16 }
  0x3b   :  { %514 = vrot.lane.b32.xlu2 %v716_v11, %s610_s16 }
  0x5d   :  { %v742_v24 = vpop.permute.xlu2 %104 }
  0x5e   :  { %v117_v32 = vmul.f32 %v588_v5, %v742_v24 }
  0x65   :  { %v107_v62 = vpop.permute.xlu2 %106 }
  0x66   :  { %v118_v39 = vmul.f32 %v588_v5, %v107_v62 }
  0x74   :  { %v15_v29 = vpop.permute.xlu0 %14  ;;  %v19_v35 = vpop.permute.xlu1 %18 }
  0x75   :  { %v30_v48 = vmul.f32 %v585_v40, %v19_v35  ;;  %v28_v55 = vmul.f32 %v585_v40, %v15_v29  ;;  %v48_v56 = vmul.f32 %v586_v47, %v19_v35  ;;  %v46_v0 = vmul.f32 %v586_v47, %v15_v29 }
  0x76   :  { %v22_v27 = vmul.f32 %v584_v60, %v15_v29  ;;  %v65_v35 = vmul.f32 %v750_v26, %v641_v2  ;;  %v157_v2 = vpop.permute.xlu2 %156  ;;  %v111_v26 = vmul.f32 %v587_v8, %v742_v24 }
  0x77   :  { %v38_v1 = vrot.slane %v30_v48, 1  ;;  %v35_v19 = vrot.slane %v28_v55, 1  ;;  %v56_v20 = vrot.slane %v48_v56, 2  ;;  %v53_v31 = vrot.slane %v46_v0, 2  ;;  %v590_v48 = vld [vmem:[%s1017_s1 + $0xc] ss:$0 sm:$0xff] }
  0x78   :  { %v134_v55 = vmul.f32 %v589_v28, %v742_v24  ;;  %v80_v56 = vsel %vm34_vm0, %v77_v46, %v79_v45  ;;  %v135_v0 = vmul.f32 %v589_v28, %v107_v62  ;;  %v591_v24 = vld [vmem:[%s1017_s1 + $0xf] ss:$0 sm:$0xff] }
  0x7a   :  { %v140_v62 = vrot.slane %v134_v55, 2 }
  0x7c   :  { %v17_v61 = vpop.permute.xlu0 %16  ;;  %v103_v18 = vpop.permute.xlu1 %102 }
  0x7d   :  { %v29_v12 = vmul.f32 %v585_v40, %v17_v61  ;;  %v47_v13 = vmul.f32 %v586_v47, %v17_v61  ;;  %v23_v30 = vmul.f32 %v584_v60, %v17_v61  ;;  %v368_v40 = vrot.slane %v361_v17, 2 }
  0x7e   :  { %v116_v47 = vmul.f32 %v588_v5, %v103_v18  ;;  %v123_v61 = vrot.slane %v117_v32, 1  ;;  %v97_v5 = vsel %vm52_vm1, %v94_v57, %v96_v54 }
  0x7f   :  { %v36_v21 = vrot.slane %v29_v12, 1  ;;  %v54_v22 = vrot.slane %v47_v13, 2  ;;  %v125_v13 = vrot.slane %v118_v39, 1  ;;  %v185_v39 = vmul.f32 %v591_v24, %v157_v2 }
  0x80   :  { %v122_v45 = vrot.slane %v116_v47, 1 }
  0x81   :  { %v37_v33 = vsel %vm34_vm0, %v35_v19, %v36_v21  ;;  %v39_v34 = vsel %vm34_vm0, %v36_v21, %v38_v1  ;;  %v55_v42 = vsel %vm52_vm1, %v53_v31, %v54_v22  ;;  %v57_v43 = vsel %vm52_vm1, %v54_v22, %v56_v20 }
  0x82   :  { %v42_v29 = vadd.f32 %v37_v33, %v22_v27  ;;  %v43_v38 = vadd.f32 %v39_v34, %v23_v30  ;;  %v78_v1 = vsel %vm34_vm0, %v76_v44, %v77_v46  ;;  %v95_v21 = vsel %vm52_vm1, %v93_v53, %v94_v57  ;;  %v592_v46 = vld [vmem:[%s1017_s1 + $0x9] ss:$0 sm:$0xff] }
  0x83   :  { %v133_v22 = vmul.f32 %v589_v28, %v103_v18  ;;  %v168_v27 = vmul.f32 %v590_v48, %v157_v2  ;;  %v142_v53 = vrot.slane %v135_v0, 2  ;;  %v869_v28 = vsel %vm52_vm1, %v366_v15, %v368_v40 }
  0x84   :  { %v60_v59 = vadd.f32 %v55_v42, %v42_v29  ;;  %v61_v60 = vadd.f32 %v57_v43, %v43_v38  ;;  %v155_v19 = vpop.permute.xlu1 %154  ;;  %v153_v20 = vpop.permute.xlu0 %152  ;;  %v126_v32 = vsel %vm34_vm0, %v123_v61, %v125_v13  ;;  %v110_v34 = vmul.f32 %v587_v8, %v103_v18 }
  0x85   :  { %v167_v54 = vmul.f32 %v590_v48, %v155_v19  ;;  %v166_v57 = vmul.f32 %v590_v48, %v153_v20  ;;  %v139_v29 = vrot.slane %v133_v22, 2  ;;  %v175_v38 = vrot.slane %v168_v27, 1  ;;  %v243_v48 = vpop.permute.xlu2 %242 }
  0x86   :  { %v67_v12 = vadd.f32 %v65_v35, %v61_v60  ;;  %v66_v17 = vadd.f32 %v785_v41, %v60_v59  ;;  %v864_v41 = vsel %vm34_vm0, %v349_v14, %v351_v25  ;;  %v124_v35 = vsel %vm34_vm0, %v122_v45, %v123_v61 }
  0x87   :  { %v160_v43 = vmul.f32 %v592_v46, %v153_v20  ;;  %v183_v47 = vmul.f32 %v591_v24, %v153_v20  ;;  %v173_v55 = vrot.slane %v167_v54, 1  ;;  %v172_v59 = vrot.slane %v166_v57, 1 }
  0x88   :  { %v84_v30 = vadd.f32 %v80_v56, %v67_v12  ;;  %v83_v44 = vadd.f32 %v78_v1, %v66_v17  ;;  %v184_v56 = vmul.f32 %v591_v24, %v155_v19  ;;  %v878_v40 = vsel %vm34_vm0, %v348_v16, %v349_v14  ;;  %v594_v17 = vld [vmem:[%s1017_s1 + $0x11] ss:$0 sm:$0xff] }
  0x89   :  { %v161_v60 = vmul.f32 %v592_v46, %v155_v19  ;;  %v143_v0 = vsel %vm52_vm1, %v140_v62, %v142_v53  ;;  %v141_v49 = vsel %vm52_vm1, %v139_v29, %v140_v62  ;;  %v192_v14 = vrot.slane %v185_v39, 2  ;;  %v596_v62 = vld [vmem:[%s1017_s1 + $0x15] ss:$0 sm:$0xff] }
  0x8a   :  { %v101_v31 = vadd.f32 %v97_v5, %v84_v30  ;;  %v100_v33 = vadd.f32 %v95_v21, %v83_v44  ;;  %v176_v12 = vsel %vm34_vm0, %v173_v55, %v175_v38  ;;  %v190_v5 = vrot.slane %v184_v56, 2  ;;  %v597_v38 = vld [vmem:[%s1017_s1 + $0x18] ss:$0 sm:$0xff] }
  0x8b   :  { %v174_v50 = vsel %vm34_vm0, %v172_v59, %v173_v55  ;;  %v189_v58 = vrot.slane %v183_v47, 2  ;;  %v201_v19 = vmul.f32 %v576_v51, %v656_v3  ;;  %v200_v20 = vmul.f32 %v576_v51, %v661_v4  ;;  %v595_v3 = vld [vmem:[%s1017_s1 + $0xb] ss:$0 sm:$0xff] }
  0x8c   :  { %v113_v25 = vadd.f32 %v111_v26, %v101_v31  ;;  %v112_v42 = vadd.f32 %v110_v34, %v100_v33  ;;  %v241_v61 = vpop.permute.xlu1 %240  ;;  %v239_v2 = vpop.permute.xlu0 %238  ;;  %v885_v26 = vsel %vm52_vm1, %v365_v23, %v366_v15  ;;  %v593_v15 = vld [vmem:[%s1017_s1 + $0xe] ss:$0 sm:$0xff]  ;;  %v193_v22 = vsel %vm52_vm1, %v190_v5, %v192_v14 }
  0x8d   :  { %v191_v24 = vsel %vm52_vm1, %v189_v58, %v190_v5  ;;  %v254_v27 = vmul.f32 %v593_v15, %v243_v48  ;;  %v253_v46 = vmul.f32 %v593_v15, %v241_v61  ;;  %v252_v53 = vmul.f32 %v593_v15, %v239_v2  ;;  %v293_v54 = vpop.permute.xlu2 %292 }
  0x8e   :  { %v130_v18 = vadd.f32 %v126_v32, %v113_v25  ;;  %v129_v8 = vadd.f32 %v124_v35, %v112_v42  ;;  %v271_v57 = vmul.f32 %v594_v17, %v243_v48  ;;  %v270_v35 = vmul.f32 %v594_v17, %v241_v61 }
  0x8f   :  { %v261_v34 = vrot.slane %v254_v27, 1  ;;  %v269_v29 = vmul.f32 %v594_v17, %v239_v2  ;;  %v304_v39 = vmul.f32 %v596_v62, %v293_v54  ;;  %v259_v42 = vrot.slane %v253_v46, 1 }
  0x90   :  { %v147_v16 = vadd.f32 %v143_v0, %v130_v18  ;;  %v146_v1 = vadd.f32 %v141_v49, %v129_v8  ;;  %v258_v47 = vrot.slane %v252_v53, 1  ;;  %v278_v48 = vrot.slane %v271_v57, 2  ;;  %v598_v0 = vld [vmem:[%s1017_s1 + $0x12] ss:$0 sm:$0xff]  ;;  %v599_v53 = vld [vmem:[%s1017_s1 + $0x17] ss:$0 sm:$0xff] }
  0x91   :  { %v247_v18 = vmul.f32 %v595_v3, %v241_v61  ;;  %v276_v49 = vrot.slane %v270_v35, 2  ;;  %v275_v51 = vrot.slane %v269_v29, 2  ;;  %v321_v14 = vmul.f32 %v597_v38, %v293_v54 }
  0x92   :  { %v163_v23 = vadd.f32 %v161_v60, %v147_v16  ;;  %v162_v13 = vadd.f32 %v160_v43, %v146_v1  ;;  %v246_v60 = vmul.f32 %v595_v3, %v239_v2 }
  0x94   :  { %v180_v21 = vadd.f32 %v176_v12, %v163_v23  ;;  %v179_v45 = vadd.f32 %v174_v50, %v162_v13  ;;  %v291_v32 = vpop.permute.xlu1 %290  ;;  %v289_v33 = vpop.permute.xlu0 %288  ;;  %v260_v12 = vsel %vm34_vm0, %v258_v47, %v259_v42 }
  0x95   :  { %v303_v55 = vmul.f32 %v596_v62, %v291_v32  ;;  %v302_v56 = vmul.f32 %v596_v62, %v289_v33  ;;  %v379_v5 = vpop.permute.xlu2 %378  ;;  %v320_v61 = vmul.f32 %v597_v38, %v291_v32  ;;  %v297_v15 = vmul.f32 %v598_v0, %v291_v32 }
  0x96   :  { %v197_v30 = vadd.f32 %v193_v22, %v180_v21  ;;  %v196_v44 = vadd.f32 %v191_v24, %v179_v45  ;;  %v296_v23 = vmul.f32 %v598_v0, %v289_v33  ;;  %v277_v21 = vsel %vm52_vm1, %v275_v51, %v276_v49  ;;  %v582_v45 = vld [vmem:[%s1017_s1 + $0x1f] ss:$0 sm:$0xff] }
  0x97   :  { %v308_v50 = vrot.slane %v302_v56, 1  ;;  %v328_v22 = vrot.slane %v321_v14, 2  ;;  %v941_v32 = vmul.f32 %v582_v45, %v711_v10  ;;  %v601_v56 = vld [vmem:[%s1017_s1 + $0x14] ss:$0 sm:$0xff] }
  0x98   :  { %v203_v4 = vadd.f32 %v201_v19, %v197_v30  ;;  %v202_v31 = vadd.f32 %v200_v20, %v196_v44  ;;  %v579_v19 = vld [vmem:[%s1017_s1 + $0x13] ss:$0 sm:$0xff]  ;;  %v279_v20 = vsel %vm52_vm1, %v276_v49, %v278_v48  ;;  %v326_v30 = vrot.slane %v320_v61, 2 }
  0x99   :  { %v337_v3 = vmul.f32 %v579_v19, %v684_v7  ;;  %v602_v7 = vld [vmem:[%s1017_s1 + $0x1e] ss:$0 sm:$0xff]  ;;  %v485_v48 = vrot.slane %v941_v32, 1 }
  0x9a   :  { %v220_v25 = vadd.f32 %v769_v36, %v203_v4  ;;  %v219_v43 = vadd.f32 %v806_v52, %v202_v31  ;;  %v311_v36 = vrot.slane %v304_v39, 1  ;;  %v262_v52 = vsel %vm34_vm0, %v259_v42, %v261_v34  ;;  %v600_v4 = vld [vmem:[%s1017_s1 + $0x1a] ss:$0 sm:$0xff] }
  0x9b   :  { %v336_v31 = vmul.f32 %v579_v19, %v679_v6  ;;  %v329_v35 = vsel %vm52_vm1, %v326_v30, %v328_v22  ;;  %v407_v6 = vmul.f32 %v600_v4, %v379_v5 }
  0x9c   :  { %v237_v59 = vadd.f32 %v772_v37, %v220_v25  ;;  %v236_v8 = vadd.f32 %v821_v63, %v219_v43  ;;  %v309_v37 = vrot.slane %v303_v55, 1  ;;  %v319_v63 = vmul.f32 %v597_v38, %v289_v33  ;;  %v377_v13 = vpop.permute.xlu1 %376  ;;  %v375_v17 = vpop.permute.xlu0 %374 }
  0x9d   :  { %v390_v38 = vmul.f32 %v599_v53, %v379_v5  ;;  %v389_v42 = vmul.f32 %v599_v53, %v377_v13  ;;  %v388_v43 = vmul.f32 %v599_v53, %v375_v17  ;;  %v429_v47 = vpop.permute.xlu2 %428  ;;  %v950_v55 = vmul.f32 %v582_v45, %v706_v9 }
  0x9e   :  { %v249_v16 = vadd.f32 %v247_v18, %v237_v59  ;;  %v248_v1 = vadd.f32 %v246_v60, %v236_v8  ;;  %v312_v62 = vsel %vm34_vm0, %v309_v37, %v311_v36  ;;  %v310_v44 = vsel %vm34_vm0, %v308_v50, %v309_v37  ;;  %v603_v36 = vld [vmem:[%s1017_s1 + $0x21] ss:$0 sm:$0xff] }
  0x9f   :  { %v325_v46 = vrot.slane %v319_v63, 2  ;;  %v397_v0 = vrot.slane %v390_v38, 1  ;;  %v406_v49 = vmul.f32 %v600_v4, %v377_v13  ;;  %v405_v51 = vmul.f32 %v600_v4, %v375_v17  ;;  %v607_v4 = vld [vmem:[%s1017_s1 + $0x1c] ss:$0 sm:$0xff] }
  0xa0   :  { %v266_v2 = vadd.f32 %v262_v52, %v249_v16  ;;  %v265_v58 = vadd.f32 %v260_v12, %v248_v1  ;;  %v440_v14 = vmul.f32 %v602_v7, %v429_v47  ;;  %v395_v52 = vrot.slane %v389_v42, 1 }
  0xa1   :  { %v327_v29 = vsel %vm52_vm1, %v325_v46, %v326_v30  ;;  %v394_v12 = vrot.slane %v388_v43, 1  ;;  %v961_v5 = vmul.f32 %v582_v45, %v716_v11  ;;  %v414_v37 = vrot.slane %v407_v6, 2 }
  0xa2   :  { %v283_v24 = vadd.f32 %v279_v20, %v266_v2  ;;  %v282_v27 = vadd.f32 %v277_v21, %v265_v58  ;;  %v383_v2 = vmul.f32 %v601_v56, %v377_v13  ;;  %v411_v19 = vrot.slane %v405_v51, 2 }
  0xa3   :  { %v447_v20 = vrot.slane %v440_v14, 1  ;;  %v457_v21 = vmul.f32 %v603_v36, %v429_v47  ;;  %v398_v22 = vsel %vm34_vm0, %v395_v52, %v397_v0  ;;  %v396_v13 = vsel %vm34_vm0, %v394_v12, %v395_v52 }
  0xa4   :  { %v299_v54 = vadd.f32 %v297_v15, %v283_v24  ;;  %v298_v57 = vadd.f32 %v296_v23, %v282_v27  ;;  %v427_v8 = vpop.permute.xlu1 %426  ;;  %v425_v60 = vpop.permute.xlu0 %424  ;;  %v382_v15 = vmul.f32 %v601_v56, %v375_v17  ;;  %v412_v23 = vrot.slane %v406_v49, 2 }
  0xa5   :  { %v439_v61 = vmul.f32 %v602_v7, %v427_v8  ;;  %v438_v50 = vmul.f32 %v602_v7, %v425_v60  ;;  %v456_v17 = vmul.f32 %v603_v36, %v427_v8  ;;  %v455_v27 = vmul.f32 %v603_v36, %v425_v60 }
  0xa6   :  { %v316_v33 = vadd.f32 %v312_v62, %v299_v54  ;;  %v315_v34 = vadd.f32 %v310_v44, %v298_v57  ;;  %v415_v54 = vsel %vm52_vm1, %v412_v23, %v414_v37  ;;  %v413_v57 = vsel %vm52_vm1, %v411_v19, %v412_v23 }
  0xa7   :  { %v444_v24 = vrot.slane %v438_v50, 1  ;;  %v462_v7 = vrot.slane %v456_v17, 2  ;;  %v484_v42 = vrot.slane %v950_v55, 1  ;;  %v487_v43 = vrot.slane %v961_v5, 1 }
  0xa8   :  { %v333_v39 = vadd.f32 %v329_v35, %v316_v33  ;;  %v332_v25 = vadd.f32 %v327_v29, %v315_v34  ;;  %v464_v33 = vrot.slane %v457_v21, 2  ;;  %v515_v29 = vpop.permute.xlu2 %514  ;;  %v473_v0 = vmul.f32 %v607_v4, %v711_v10 }
  0xa9   :  { %v472_v14 = vmul.f32 %v607_v4, %v706_v9 }
  0xaa   :  { %v339_v59 = vadd.f32 %v337_v3, %v333_v39  ;;  %v338_v18 = vadd.f32 %v336_v31, %v332_v25  ;;  %v605_v3 = vld [vmem:[%s1017_s1 + $0x20] ss:$0 sm:$0xff]  ;;  %v461_v25 = vrot.slane %v455_v27, 2 }
  0xac   :  { %v356_v16 = vadd.f32 %v864_v41, %v339_v59  ;;  %v355_v1 = vadd.f32 %v878_v40, %v338_v18  ;;  %v604_v41 = vld [vmem:[%s1017_s1 + $0x1b] ss:$0 sm:$0xff]  ;;  %v583_v40 = vld [vmem:[%s1017_s1 + $0x22] ss:$0 sm:$0xff]  ;;  %v513_v56 = vpop.permute.xlu1 %512  ;;  %v511_v59 = vpop.permute.xlu0 %510  ;;  %v463_v52 = vsel %vm52_vm1, %v461_v25, %v462_v7 }
  0xad   :  { %v433_v44 = vmul.f32 %v604_v41, %v427_v8  ;;  %v432_v46 = vmul.f32 %v604_v41, %v425_v60  ;;  %v497_v53 = vmul.f32 %v583_v40, %v716_v11  ;;  %v496_v31 = vmul.f32 %v583_v40, %v711_v10  ;;  %v606_v8 = vld [vmem:[%s1017_s1 + $0x23] ss:$0 sm:$0xff] }
  0xae   :  { %v373_v63 = vadd.f32 %v869_v28, %v356_v16  ;;  %v372_v58 = vadd.f32 %v885_v26, %v355_v1  ;;  %v445_v26 = vrot.slane %v439_v61, 1  ;;  %v495_v11 = vmul.f32 %v583_v40, %v706_v9  ;;  %v608_v61 = vld [vmem:[%s1017_s1 + $0x1d] ss:$0 sm:$0xff] }
  0xaf   :  { %v504_v18 = vrot.slane %v497_v53, 2  ;;  %v526_v60 = vmul.f32 %v605_v3, %v515_v29  ;;  %v502_v49 = vrot.slane %v496_v31, 2  ;;  %v465_v16 = vsel %vm52_vm1, %v462_v7, %v464_v33 }
  0xb0   :  { %v385_v45 = vadd.f32 %v383_v2, %v373_v63  ;;  %v384_v28 = vadd.f32 %v382_v15, %v372_v58  ;;  %v448_v38 = vsel %vm34_vm0, %v445_v26, %v447_v20  ;;  %v446_v39 = vsel %vm34_vm0, %v444_v24, %v445_v26 }
  0xb1   :  { %v501_v55 = vrot.slane %v495_v11, 2  ;;  %v525_v1 = vmul.f32 %v605_v3, %v513_v56  ;;  %v524_v12 = vmul.f32 %v605_v3, %v511_v59  ;;  %v533_v50 = vrot.slane %v526_v60, 1 }
  0xb2   :  { %v402_v62 = vadd.f32 %v398_v22, %v385_v45  ;;  %v401_v30 = vadd.f32 %v396_v13, %v384_v28  ;;  %v543_v10 = vmul.f32 %v606_v8, %v515_v29  ;;  %v488_v63 = vsel %vm34_vm0, %v485_v48, %v487_v43 }
  0xb3   :  { %v486_v9 = vsel %vm34_vm0, %v484_v42, %v485_v48  ;;  %v505_v2 = vsel %vm52_vm1, %v502_v49, %v504_v18  ;;  %v503_v15 = vsel %vm52_vm1, %v501_v55, %v502_v49  ;;  %v531_v40 = vrot.slane %v525_v1, 1 }
  0xb4   :  { %v419_v34 = vadd.f32 %v415_v54, %v402_v62  ;;  %v418_v35 = vadd.f32 %v413_v57, %v401_v30  ;;  %v542_v23 = vmul.f32 %v606_v8, %v513_v56  ;;  %v530_v19 = vrot.slane %v524_v12, 1 }
  0xb5   :  { %v541_v20 = vmul.f32 %v606_v8, %v511_v59  ;;  %v519_v45 = vmul.f32 %v608_v61, %v513_v56  ;;  %v518_v28 = vmul.f32 %v608_v61, %v511_v59  ;;  %v550_v13 = vrot.slane %v543_v10, 2 }
  0xb6   :  { %v435_v47 = vadd.f32 %v433_v44, %v419_v34  ;;  %v434_v6 = vadd.f32 %v432_v46, %v418_v35  ;;  %v534_v32 = vsel %vm34_vm0, %v531_v40, %v533_v50  ;;  %v548_v48 = vrot.slane %v542_v23, 2 }
  0xb7   :  { %v532_v24 = vsel %vm34_vm0, %v530_v19, %v531_v40  ;;  %v547_v27 = vrot.slane %v541_v20, 2 }
  0xb8   :  { %v452_v51 = vadd.f32 %v448_v38, %v435_v47  ;;  %v451_v36 = vadd.f32 %v446_v39, %v434_v6  ;;  %v551_v53 = vsel %vm52_vm1, %v548_v48, %v550_v13 }
  0xb9   :  { %v549_v54 = vsel %vm52_vm1, %v547_v27, %v548_v48 }
  0xba   :  { %v469_v5 = vadd.f32 %v465_v16, %v452_v51  ;;  %v468_v37 = vadd.f32 %v463_v52, %v451_v36 }
  0xbc   :  { %v475_v58 = vadd.f32 %v473_v0, %v469_v5  ;;  %v474_v41 = vadd.f32 %v472_v14, %v468_v37 }
  0xbe   :  { %v492_v21 = vadd.f32 %v488_v63, %v475_v58  ;;  %v491_v22 = vadd.f32 %v486_v9, %v474_v41 }
  0xc0   :  { %v509_v26 = vadd.f32 %v505_v2, %v492_v21  ;;  %v508_v17 = vadd.f32 %v503_v15, %v491_v22 }
  0xc2   :  { %v521_v62 = vadd.f32 %v519_v45, %v509_v26  ;;  %v520_v30 = vadd.f32 %v518_v28, %v508_v17 }
  0xc4   :  { %v538_v44 = vadd.f32 %v534_v32, %v521_v62  ;;  %v537_v46 = vadd.f32 %v532_v24, %v520_v30 }
  0xc6   :  { %v555_v57 = vadd.f32 %v551_v53, %v538_v44  ;;  %v554_v3 = vadd.f32 %v549_v54, %v537_v46 }
  0xc8   :  { %557 = vst [vmem:[%s1018_s2 + $0x8] sm:$0xff] %v555_v57 }
  0xc9   :  { %556 = vst [vmem:[%s1018_s2] sm:$0xff] %v554_v3 }

</bundles_post_ra>
